<compile_context>
chip_gen: v5e
topology: v5e:2x2
jax: 0.10.0
libtpu: 0.0.40
codegen_flags: <defaults>
</compile_context>

<pallas_src>
import functools

import jax
import jax.numpy as jnp
from jax.experimental import pallas as pl
from jax.experimental.pallas import tpu as pltpu


def _round_up(n, m):
    return ((n + m - 1) // m) * m


def _se_kernel(x_ref, w1_ref, w2_ref, o_ref, *, inv_hw):
    # x_ref block: (block_b, C, HW_pad) in the storage dtype; HW_pad is the
    # lane axis (multiple of 128 -> unmasked vector stores).

    # --- Squeeze: global average pool over the spatial (lane) axis.
    # Accumulate in f32 regardless of storage dtype (bf16-safe); padded lanes
    # are zero so they don't change the sum, and inv_hw uses the true HW.
    pooled = jnp.sum(x_ref[...].astype(jnp.float32), axis=-1) * inv_hw  # (TB, C)

    # --- Excite: Linear(no bias) -> SiLU -> Linear(no bias) -> Sigmoid, f32.
    h = jnp.dot(pooled, w1_ref[...], preferred_element_type=jnp.float32)
    h = h * jax.nn.sigmoid(h)                                            # SiLU
    g = jax.nn.sigmoid(jnp.dot(h, w2_ref[...],
                               preferred_element_type=jnp.float32))      # (TB, C)

    # --- Scale: re-read the tile from VMEM (no whole-tile live value held
    # across the gate math) and multiply/store in the storage dtype.
    o_ref[...] = x_ref[...] * g.astype(o_ref.dtype)[:, :, None]


def squeeze_excitation_pallas(x, w1, w2, *, block_b=None):
    """x: (B, C, H, W) in f32 or bf16; w1: (C, hidden); w2: (hidden, C).

    Weights are stored (in_features, out_features) so application is `p @ W`,
    matching nn.Linear's `p @ weight.T` with weight of shape (out, in).
    """
    B, C, H, W = x.shape
    HW = H * W
    hidden = w1.shape[1]
    assert w1.shape == (C, hidden) and w2.shape == (hidden, C)

    # Gate math is tiny; keep the weights in f32.
    w1 = w1.astype(jnp.float32)
    w2 = w2.astype(jnp.float32)

    # ---- Lane-dense layout: pad the spatial axis to a multiple of 128. ----
    HW_pad = max(128, _round_up(HW, 128))
    x3 = x.reshape(B, C, HW)
    if HW_pad != HW:
        x3 = jnp.pad(x3, ((0, 0), (0, 0), (0, HW_pad - HW)))

    itemsize = jnp.dtype(x.dtype).itemsize
    per_sample_block_bytes = C * HW_pad * itemsize  # one sample of one tensor

    # ---- VMEM-aware block_b (per-generation budget). ----
    try:
        info = pltpu.get_tpu_info()
        vmem_capacity = int(getattr(info, "vmem_capacity_bytes", 64 << 20))
    except Exception:  # no TPU info available: assume the smallest (v7x 64 MiB)
        vmem_capacity = 64 << 20

    if block_b is None:
        # Budget for the double-buffered (input + output) pipeline blocks:
        # capacity/4 -> 32 MiB on v5e/v6e (128 MiB), 16 MiB on v7x (64 MiB).
        budget = vmem_capacity // 4
        max_by_vmem = max(1, budget // (4 * per_sample_block_bytes))
        # Keep a few grid steps so the auto-pipeline overlaps DMA with compute
        # and the batch axis stays shardable across v7x's two TensorCores.
        desired_steps = 4 if B >= 8 else (2 if B >= 2 else 1)
        block_b = max(1, min(max_by_vmem, pl.cdiv(B, desired_steps)))
    block_b = int(block_b)

    # ---- Pad batch so block_b divides it; keep the grid even when > 1. ----
    B_pad = _round_up(B, block_b)
    grid = B_pad // block_b
    if grid > 1 and grid % 2 == 1:
        grid += 1
        B_pad += block_b
    if B_pad != B:
        x3 = jnp.pad(x3, ((0, B_pad - B), (0, 0), (0, 0)))

    # Explicit scoped-VMEM limit derived from the chosen block size
    # (2x double-buffered in + out blocks, plus weights and slack).
    pipeline_bytes = 4 * block_b * per_sample_block_bytes
    vmem_limit = int(min(vmem_capacity // 2,
                         max(pipeline_bytes + (4 << 20), 16 << 20)))

    kernel = functools.partial(_se_kernel, inv_hw=1.0 / HW)

    cost = pl.CostEstimate(
        flops=int(2 * B * C * HW + 4 * B * C * hidden),
        transcendentals=int(B * (hidden + C)),
        bytes_accessed=int(2 * B * C * HW * itemsize
                           + (w1.size + w2.size) * 4),
    )

    out3 = pl.pallas_call(
        kernel,
        out_shape=jax.ShapeDtypeStruct((B_pad, C, HW_pad), x.dtype),
        grid_spec=pltpu.PrefetchScalarGridSpec(
            num_scalar_prefetch=0,
            grid=(grid,),
            in_specs=[
                pl.BlockSpec((block_b, C, HW_pad), lambda b: (b, 0, 0)),  # x
                pl.BlockSpec((C, hidden), lambda b: (0, 0)),              # W1
                pl.BlockSpec((hidden, C), lambda b: (0, 0)),              # W2
            ],
            out_specs=pl.BlockSpec((block_b, C, HW_pad), lambda b: (b, 0, 0)),
        ),
        compiler_params=pltpu.CompilerParams(
            dimension_semantics=("parallel",),
            vmem_limit_bytes=vmem_limit,
        ),
        cost_estimate=cost,
    )(x3, w1, w2)

    return out3[:B, :, :HW].reshape(B, C, H, W)


def squeeze_excitation_reference(x, w1, w2):
    """Pure-JAX reference mirroring the PyTorch forward (eval mode)."""
    pooled = x.mean(axis=(2, 3))                               # (B, C)
    h = jnp.dot(pooled, w1, precision=jax.lax.Precision.HIGHEST)
    h = h * jax.nn.sigmoid(h)                                  # SiLU
    g = jax.nn.sigmoid(jnp.dot(h, w2, precision=jax.lax.Precision.HIGHEST))
    return x * g[:, :, None, None]


def _make_case(key, batch, dim, H, W, shrinkage_rate=0.25, dtype=jnp.float32):
    hidden = max(1, int(dim * shrinkage_rate))
    kx, k1, k2 = jax.random.split(key, 3)
    x = jax.random.normal(kx, (batch, dim, H, W), dtype=jnp.float32).astype(dtype)
    # nn.Linear(dim, hidden, bias=False) / nn.Linear(hidden, dim, bias=False),
    # stored transposed as (in, out) so application is `pooled @ W`.
    w1 = jax.random.normal(k1, (dim, hidden), dtype=jnp.float32) * (dim ** -0.5)
    w2 = jax.random.normal(k2, (hidden, dim), dtype=jnp.float32) * (hidden ** -0.5)
    return x, w1, w2


if __name__ == "__main__":
    key = jax.random.PRNGKey(0)
    ka, kb, kc = jax.random.split(key, 3)

    # Case 1: dim=64, shrinkage=0.25 -> hidden=16; 16x16 spatial (HW=256,
    # already lane-dense), f32.
    x, w1, w2 = _make_case(ka, 8, 64, 16, 16)
    out = jax.block_until_ready(squeeze_excitation_pallas(x, w1, w2))
    ref = squeeze_excitation_reference(x, w1, w2)
    assert out.shape == x.shape and out.dtype == x.dtype
    assert jnp.allclose(out, ref, atol=1e-4, rtol=1e-4), \
        f"f32 max abs err {float(jnp.max(jnp.abs(out - ref)))}"

    # Case 2: bf16 activations (storage dtype preserved end-to-end; gate math
    # stays f32 inside the kernel).
    xb, w1b, w2b = _make_case(kb, 8, 64, 16, 16, dtype=jnp.bfloat16)
    outb = jax.block_until_ready(squeeze_excitation_pallas(xb, w1b, w2b))
    refb = squeeze_excitation_reference(xb.astype(jnp.float32), w1b, w2b)
    assert outb.dtype == jnp.bfloat16 and outb.shape == xb.shape
    assert jnp.allclose(outb.astype(jnp.float32), refb, atol=5e-2, rtol=5e-2), \
        f"bf16 max abs err {float(jnp.max(jnp.abs(outb.astype(jnp.float32) - refb)))}"

    # Case 3: non-lane-dense spatial (14x14 -> HW=196, padded to 256 in the
    # wrapper) and a batch size that is not a multiple of the block (padded).
    xr, w1r, w2r = _make_case(kc, 5, 32, 14, 14)
    outr = jax.block_until_ready(squeeze_excitation_pallas(xr, w1r, w2r))
    refr = squeeze_excitation_reference(xr, w1r, w2r)
    assert outr.shape == xr.shape
    assert jnp.allclose(outr, refr, atol=1e-4, rtol=1e-4), \
        f"ragged max abs err {float(jnp.max(jnp.abs(outr - refr)))}"

    print("KERNEL_OK")
</pallas_src>

<mosaic_0001>
module attributes {stable_mosaic.version = 11 : i64} {
  func.func @_se_kernel(%arg0: i32, %arg1: memref<2x64x256xf32, #tpu.memory_space<vmem>>, %arg2: memref<64x16xf32, #tpu.memory_space<vmem>>, %arg3: memref<16x64xf32, #tpu.memory_space<vmem>>, %arg4: memref<2x64x256xf32, #tpu.memory_space<vmem>>) attributes {dimension_semantics = [#tpu.dimension_semantics<parallel>], iteration_bounds = array<i64: 4>, scalar_prefetch = 0 : i64, scratch_operands = 0 : i64, tpu.core_type = #tpu.core_type<tc>, window_params = [{transform_indices = @transform_0, window_bounds = array<i64: 2, 64, 256>}, {pipeline_mode = #tpu.pipeline_mode<synchronous>, transform_indices = @transform_1, window_bounds = array<i64: 64, 16>}, {pipeline_mode = #tpu.pipeline_mode<synchronous>, transform_indices = @transform_2, window_bounds = array<i64: 16, 64>}, {transform_indices = @transform_3, window_bounds = array<i64: 2, 64, 256>}]} {
    %c0 = arith.constant 0 : index
    %c0_0 = arith.constant 0 : index
    %c0_1 = arith.constant 0 : index
    %0 = vector.load %arg1[%c0, %c0_0, %c0_1] : memref<2x64x256xf32, #tpu.memory_space<vmem>>, vector<2x64x256xf32>
    %cst = arith.constant dense<0.000000e+00> : vector<2x64xf32>
    %1 = vector.multi_reduction <add>, %0, %cst [2] : vector<2x64x256xf32> to vector<2x64xf32>
    %cst_2 = arith.constant 3.906250e-03 : f32
    %2 = vector.broadcast %cst_2 : f32 to vector<2x64xf32>
    %3 = arith.mulf %1, %2 : vector<2x64xf32>
    %c0_3 = arith.constant 0 : index
    %c0_4 = arith.constant 0 : index
    %4 = vector.load %arg2[%c0_3, %c0_4] : memref<64x16xf32, #tpu.memory_space<vmem>>, vector<64x16xf32>
    %cst_5 = arith.constant dense<0.000000e+00> : vector<2x16xf32>
    %5 = tpu.matmul %3, %4, %cst_5 {dimension_numbers = #tpu.dot_dimension_numbers<[1], [0], [0], [1], [0, 0, 1, 1], [], []>} : vector<2x64xf32>, vector<64x16xf32>, vector<2x16xf32> -> vector<2x16xf32>
    %6 = arith.negf %5 : vector<2x16xf32>
    %7 = math.exp %6 : vector<2x16xf32>
    %cst_6 = arith.constant 1.000000e+00 : f32
    %8 = vector.broadcast %cst_6 : f32 to vector<2x16xf32>
    %9 = arith.addf %8, %7 : vector<2x16xf32>
    %10 = arith.divf %8, %9 : vector<2x16xf32>
    %11 = arith.mulf %5, %10 : vector<2x16xf32>
    %c0_7 = arith.constant 0 : index
    %c0_8 = arith.constant 0 : index
    %12 = vector.load %arg3[%c0_7, %c0_8] : memref<16x64xf32, #tpu.memory_space<vmem>>, vector<16x64xf32>
    %cst_9 = arith.constant dense<0.000000e+00> : vector<2x64xf32>
    %13 = tpu.matmul %11, %12, %cst_9 {dimension_numbers = #tpu.dot_dimension_numbers<[1], [0], [0], [1], [0, 0, 1, 1], [], []>} : vector<2x16xf32>, vector<16x64xf32>, vector<2x64xf32> -> vector<2x64xf32>
    %14 = arith.negf %13 : vector<2x64xf32>
    %15 = math.exp %14 : vector<2x64xf32>
    %cst_10 = arith.constant 1.000000e+00 : f32
    %16 = vector.broadcast %cst_10 : f32 to vector<2x64xf32>
    %17 = arith.addf %16, %15 : vector<2x64xf32>
    %18 = arith.divf %16, %17 : vector<2x64xf32>
    %c0_11 = arith.constant 0 : index
    %c0_12 = arith.constant 0 : index
    %c0_13 = arith.constant 0 : index
    %19 = vector.load %arg1[%c0_11, %c0_12, %c0_13] : memref<2x64x256xf32, #tpu.memory_space<vmem>>, vector<2x64x256xf32>
    %20 = vector.shape_cast %18 : vector<2x64xf32> to vector<2x64x1xf32>
    %21 = vector.broadcast %20 : vector<2x64x1xf32> to vector<2x64x256xf32>
    %22 = arith.mulf %19, %21 : vector<2x64x256xf32>
    %c0_14 = arith.constant 0 : index
    %c0_15 = arith.constant 0 : index
    %c0_16 = arith.constant 0 : index
    %23 = vector.load %arg4[%c0_14, %c0_15, %c0_16] : memref<2x64x256xf32, #tpu.memory_space<vmem>>, vector<2x64x256xf32>
    tpu.vector_store %arg4[%c0_14, %c0_15, %c0_16], %22 {strides = array<i32>} : memref<2x64x256xf32, #tpu.memory_space<vmem>>, vector<2x64x256xf32>,
    return
  }
  func.func @transform_0(%arg0: i32) -> (i32, i32, i32) {
    %c0_i32 = arith.constant 0 : i32
    %c0_i32_0 = arith.constant 0 : i32
    %c0_i32_1 = arith.constant 0 : i32
    return %arg0, %c0_i32, %c0_i32_0 : i32, i32, i32
  }
  func.func @transform_1(%arg0: i32) -> (i32, i32) {
    %c0_i32 = arith.constant 0 : i32
    %c0_i32_0 = arith.constant 0 : i32
    %c0_i32_1 = arith.constant 0 : i32
    return %c0_i32, %c0_i32_0 : i32, i32
  }
  func.func @transform_2(%arg0: i32) -> (i32, i32) {
    %c0_i32 = arith.constant 0 : i32
    %c0_i32_0 = arith.constant 0 : i32
    %c0_i32_1 = arith.constant 0 : i32
    return %c0_i32, %c0_i32_0 : i32, i32
  }
  func.func @transform_3(%arg0: i32) -> (i32, i32, i32) {
    %c0_i32 = arith.constant 0 : i32
    %c0_i32_0 = arith.constant 0 : i32
    %c0_i32_1 = arith.constant 0 : i32
    return %arg0, %c0_i32, %c0_i32_0 : i32, i32, i32
  }
}

</mosaic_0001>

<bundles_post_ra>
// kernel: tpu_custom_call.1
= control target key start
LH: loop header
LB: loop body
LE: loop exit
PB: predicated region body
PF: predicated region fallthrough
CT: control target
= control target key end

     0   :  { %8 = vsyncpa [#allocation3], 0  ;;  %s1289_s0 = inlined_call_operand.hbm [shape: f32[8,64,256], index: 0, kind: input, shape index: {}]   ;;  %s1290_s1 = inlined_call_operand.vmem [shape: f32[64,16], index: 1, kind: input, shape index: {}]   ;;  %s1291_s2 = inlined_call_operand.vmem [shape: f32[16,64], index: 2, kind: input, shape index: {}]   ;;  %s1292_s3 = inlined_call_operand.hbm [shape: f32[8,64,256], index: 3, kind: output, shape index: {}]  }
   0x1   :  { %10 = vsyncpa [#allocation3 + $0x1], 0 }
   0x2   :  { %11 = vsyncpa [#allocation4], 0 }
   0x3   :  { %13 = vsyncpa [#allocation4 + $0x1], 0  ;;  %s923_s12 = smov 0   ;;  %s925_s13 = smov 0  }
   0x4   :  { %s927_s14 = smov 0   ;;  %s929_s15 = smov 0  }
   0x5 LB: > { %s944_s16 = sadd.s32 4294967295, %s897_s15   ;;  %s702_s17 = sadd.s32 4294967294, %s897_s15   ;;  %s897_s15 = sphi %s929_s15, %s1309_s15   ;;  %s893_s14 = sphi %s927_s14, %s1308_s14   ;;  %s889_s13 = sphi %s925_s13, %s1307_s13   ;;  %s885_s12 = sphi %s923_s12, %s1306_s12  }
   0x6   : > { %s948_s18 = sadd.s32 1, %s897_s15   ;;  %s26_s19 = sadd.s32 1, %s893_s14 }
   0x7   : > { %s23_s20 = ssub.s32 %s897_s15, %s948_s18  ;;  %p33_p0 = scmp.ne.s32.totalorder %s893_s14, %s889_s13 }
   0x8   : > { %p24_p1 = scmp.eq.s32.totalorder %s23_s20, 0  ;;  %p34_p2 = scmp.eq.s32.totalorder %s897_s15, 0 }
   0x9   : > { %p39_p3 = scmp.ne.s32.totalorder %s889_s13, %s885_s12  ;;  %p40_p4 = scmp.eq.s32.totalorder %s944_s16, 0 }
   0xa   : > { %s960_s21 = scalar_select %p24_p1, %s893_s14, %s26_s19  }
   0xb   : > { %p962_p5 = por %p34_p2, %p33_p0  ;;  %p966_p6 = por %p40_p4, %p39_p3 }
   0xc   : > { %p105_p7 = scmp.eq.s32.totalorder %s944_s16, 3  ;;  %p111_p8 = scmp.eq.s32.totalorder %s702_s17, 3 }
   0xd   : > { %p738_p9 = scmp.lt.s32.totalorder %s897_s15, 4  ;;  %s137_s26 = sand.u32 1, %s893_s14  }
   0xe   : > { %p972_p10 = por %p105_p7, %p33_p0  ;;  %p976_p11 = por %p111_p8, %p39_p3 }
   0xf   : > { %s723_s27 = sshll.u32 %s897_s15, 8  ;;  %s705_s28 = sshll.u32 %s137_s26, 8 }
  0x10   : > { %s147_s4 = scalar_lea.hbm %s1289_s0, %s723_s27  ;;  %s141_s6 = scalar_lea.vmem [#allocation2], %s705_s28 }
  0x11   : > { %s148_s5 = sshll.u32 %s147_s4, 4  ;;  %s150_s7 = sshll.u32 %s141_s6, 4  ;;  %s149_s5 = int_to_ptr.hbm [resolvable:$true] %s148_s5  ;;  %s151_s7 = int_to_ptr.vmem [resolvable:$true] %s150_s7 }
  0x12   : > { %p987_p12 = pnand %p738_p9, %p962_p5  ;;  %p709_p13 = scmp.ge.s32.totalorder %s897_s15, 1 }
  0x13   : > { %p158_p0 = scmp.lt.s32.totalorder %s897_s15, 5  ;;  %s138_s9 = scalar_lea.sflag [#allocation3], %s137_s26 }
  0x14   : > { %s801_s10 = sshra.s32 %s149_s5, 4  ;;  %p805_p2 = pneg %p987_p12  ;;  %s802_s10 = int_to_ptr.hbm [resolvable:$true] %s801_s10 }
  0x15   : > { %s803_s11 = scalar_lea.hbm %s802_s10, 256  ;;  %s808_s20 = scalar_lea.hbm %s1289_s0, 1024 }
  0x16   : > { %p804_p1 = scmp.ne.s32.totalorder %s802_s10, %s803_s11  ;;  %p809_p5 = scmp.lt.s32.totalorder %s802_s10, %s1289_s0 }
  0x17   : > { %p810_p7 = scmp.lt.s32.totalorder %s808_s20, %s803_s11 }
  0x18   : > { %p806_p3 = pnand %p805_p2, %p804_p1 }
  0x19   : > { %p811_p8 = por %p810_p7, %p809_p5 }
  0x1a   : > { %p807_p4 = pneg %p806_p3 }
  0x1c   : > { %p812_p9 = pnand %p811_p8, %p807_p4 }
  0x1e   : > { %815 = shalt.err (!%p812_p9)
}
  0x1f   : > { %s899_s26 = smov 256   ;;  %s900_s28 = smov 16  }
  0x20   : > { %733 = dma.hbm_to_vmem [thread:$0]  (!%p987_p12), %s149_s5, 4096, %s151_s7, %s138_s9, %s899_s26, %s899_s26, %s900_s28  }
  0x21   : > { %p159_p1 = pnand %p709_p13, %p158_p0 }
  0x23   : > { %162 = sbr.rel (%p159_p1) target bundleno = 725 (0x2d5), region = 32 }
  0x28   : > { %s1008_s29 = sand.u32 1, %s889_s13  }
  0x29   : > { %s710_s30 = sshll.u32 %s1008_s29, 8  ;;  %s165_s4 = scalar_lea.sflag [#allocation3], %s1008_s29 }
  0x2a   : > { %s1014_s6 = scalar_lea.vmem [#allocation2], %s710_s30 }
  0x2b   : > { %876 = dma.done.wait (%p966_p6), %s165_s4, 4096  }
  0x2c   : > { %878 = vsyncadd (%p966_p6), %s165_s4, 4294963200  ;;  %v1021_v0 = vld [vmem:[%s1014_s6 + $0x80] sm:$0xff]  ;;  %v1024_v1 = vld [vmem:[%s1014_s6 + $0x88] sm:$0xff]  ;;  %vm319_vm0 = vcmask 130112   ;;  %vm323_vm1 = vcmask 195712   ;;  %vm327_vm2 = vcmask 261312  }
  0x2d   : > { %v1027_v2 = vld [vmem:[%s1014_s6] sm:$0xff]  ;;  %v250_v3 = vadd.f32 %v1024_v1, %v1021_v0  ;;  %v1032_v4 = vld [vmem:[%s1014_s6 + $0x8] sm:$0xff]  ;;  %v1045_v9 = vld [vmem:[%s1014_s6 + $0x90] sm:$0xff]  ;;  %vm331_vm3 = vcmask 326912   ;;  %vm335_vm4 = vcmask 392512   ;;  %vm339_vm5 = vcmask 458112  }
  0x2e   : > { %v1035_v5 = vld [vmem:[%s1014_s6 + $0x20] sm:$0xff]  ;;  %v1038_v6 = vld [vmem:[%s1014_s6 + $0x28] sm:$0xff]  ;;  %v226_v7 = vadd.f32 %v1032_v4, %v1027_v2  ;;  %v1048_v10 = vld [vmem:[%s1014_s6 + $0x98] sm:$0xff]  ;;  %vm343_vm6 = vcmask 523712   ;;  %vm360_vm7 = vcmask 1041409   ;;  %vm362_vm8 = vcmask 523264  }
  0x2f   : > { %v232_v8 = vadd.f32 %v1038_v6, %v1035_v5  ;;  %251 = vadd.xlane.f32.xlu1 %v250_v3  ;;  %v1051_v11 = vld [vmem:[%s1014_s6 + $0x10] sm:$0xff]  ;;  %v1054_v12 = vld [vmem:[%s1014_s6 + $0x18] sm:$0xff]  ;;  %v1057_v13 = vld [vmem:[%s1014_s6 + $0xa0] sm:$0xff]  ;;  %v253_v15 = vadd.f32 %v1048_v10, %v1045_v9  ;;  %vm407_vm13 = vcmask 130048   ;;  %s1192_s9 = scalar_lea.vmem [#allocation5], %s710_s30  ;;  %s725_s30 = sshll.u32 %s944_s16, 8 }
  0x30   : > { %227 = vadd.xlane.f32.xlu0 %v226_v7  ;;  %v1060_v14 = vld [vmem:[%s1014_s6 + $0xa8] sm:$0xff]  ;;  %v229_v16 = vadd.f32 %v1054_v12, %v1051_v11  ;;  %v1069_v18 = vld [vmem:[%s1014_s6 + $0xb0] sm:$0xff]  ;;  %v1072_v19 = vld [vmem:[%s1014_s6 + $0xb8] sm:$0xff]  ;;  %v1293_v7 = vlaneseq  ;;  %s625_s17 = scalar_lea.hbm %s1292_s3, %s725_s30  ;;  %s626_s19 = sshll.u32 %s1192_s9, 4  ;;  %s627_s19 = int_to_ptr.vmem [resolvable:$true] %s626_s19 }
  0x31   : > { %233 = vadd.xlane.f32.xlu2 %v232_v8  ;;  %v256_v17 = vadd.f32 %v1060_v14, %v1057_v13  ;;  %v1075_v20 = vld [vmem:[%s1014_s6 + $0x30] sm:$0xff]  ;;  %v1078_v21 = vld [vmem:[%s1014_s6 + $0x38] sm:$0xff]  ;;  %v1081_v22 = vld [vmem:[%s1014_s6 + $0x40] sm:$0xff]  ;;  %v259_v24 = vadd.f32 %v1072_v19, %v1069_v18  ;;  %s628_s20 = sshll.u32 %s625_s17, 4  ;;  %s613_s22 = scalar_lea.sflag [#allocation4], %s1008_s29  ;;  %s629_s20 = int_to_ptr.hbm [resolvable:$true] %s628_s20 }
  0x32   : > { %v1084_v23 = vld [vmem:[%s1014_s6 + $0x48] sm:$0xff]  ;;  %v235_v25 = vadd.f32 %v1078_v21, %v1075_v20  ;;  %v1093_v27 = vld [vmem:[%s1014_s6 + $0x50] sm:$0xff]  ;;  %v1096_v28 = vld [vmem:[%s1014_s6 + $0x58] sm:$0xff]  ;;  %v315_v8 = vand.u32 127, %v1293_v7  ;;  %s845_s16 = sshra.s32 %s629_s20, 4  ;;  %s851_s4 = scalar_lea.hbm %s1292_s3, 1024  ;;  %s846_s16 = int_to_ptr.hbm [resolvable:$true] %s845_s16 }
  0x33   : > { %v238_v26 = vadd.f32 %v1084_v23, %v1081_v22  ;;  %v1099_v29 = vld [vmem:[%s1014_s6 + $0xc0] sm:$0xff]  ;;  %v1102_v30 = vld [vmem:[%s1014_s6 + $0xc8] sm:$0xff]  ;;  %v1105_v31 = vld [vmem:[%s1014_s6 + $0xd0] sm:$0xff]  ;;  %v241_v33 = vadd.f32 %v1096_v28, %v1093_v27  ;;  %s847_s27 = scalar_lea.hbm %s846_s16, 256  ;;  %p852_p0 = scmp.lt.s32.totalorder %s846_s16, %s1292_s3 }
  0x34   : > { %1301 = vst [vmem:[#allocation8_spill] sm:$0xff] %v1105_v31  ;;  %v1108_v32 = vld [vmem:[%s1014_s6 + $0xd8] sm:$0xff]  ;;  %v262_v34 = vadd.f32 %v1102_v30, %v1099_v29  ;;  %v1117_v36 = vld [vmem:[%s1014_s6 + $0xe0] sm:$0xff]  ;;  %v1120_v37 = vld [vmem:[%s1014_s6 + $0xe8] sm:$0xff]  ;;  %p848_p6 = scmp.ne.s32.totalorder %s846_s16, %s847_s27  ;;  %p853_p2 = scmp.lt.s32.totalorder %s851_s4, %s847_s27 }
  0x35   : > { %1302 = vst [vmem:[#allocation9_spill] sm:$0xff] %v1108_v32  ;;  %v265_v35 = vadd.f32 %v1108_v32, %v1105_v31  ;;  %v1123_v38 = vld [vmem:[%s1014_s6 + $0x60] sm:$0xff]  ;;  %v1126_v39 = vld [vmem:[%s1014_s6 + $0x68] sm:$0xff]  ;;  %v1129_v40 = vld [vmem:[%s1014_s6 + $0x70] sm:$0xff]  ;;  %v268_v42 = vadd.f32 %v1120_v37, %v1117_v36 }
  0x36   : > { %v1132_v41 = vld [vmem:[%s1014_s6 + $0x78] sm:$0xff]  ;;  %v244_v43 = vadd.f32 %v1126_v39, %v1123_v38  ;;  %v1141_v45 = vld [vmem:[%s1014_s6 + $0xf0] sm:$0xff]  ;;  %v295_v53 = vld [vmem:[%s1290_s1 + $0x28] sm:$0xff]  ;;  %p849_p12 = pnand %p848_p6, %p972_p10  ;;  %p854_p3 = por %p853_p2, %p852_p0 }
  0x37   : > { %254 = vadd.xlane.f32.xlu1 %v253_v15  ;;  %v247_v44 = vadd.f32 %v1132_v41, %v1129_v40  ;;  %v1144_v46 = vld [vmem:[%s1014_s6 + $0xf8] sm:$0xff]  ;;  %v296_v52 = vld [vmem:[%s1290_s1 + $0x30] sm:$0xff]  ;;  %v294_v54 = vld [vmem:[%s1290_s1 + $0x20] sm:$0xff] }
  0x38   : > { %230 = vadd.xlane.f32.xlu0 %v229_v16  ;;  %v271_v47 = vadd.f32 %v1144_v46, %v1141_v45  ;;  %v297_v48 = vld [vmem:[%s1290_s1 + $0x38] sm:$0xff]  ;;  %v292_v59 = vld [vmem:[%s1290_s1 + $0x10] sm:$0xff]  ;;  %v291_v60 = vld [vmem:[%s1290_s1 + $0x8] sm:$0xff]  ;;  %p850_p13 = pneg %p849_p12 }
  0x39   : > { %257 = vadd.xlane.f32.xlu2 %v256_v17  ;;  %373 = vmatpush.msra.mxu0 %v297_v48  ;;  %v293_v55 = vld [vmem:[%s1290_s1 + $0x18] sm:$0xff]  ;;  %v290_v61 = vld [vmem:[%s1290_s1] sm:$0xff] }
  0x3a   : > { %p855_p4 = pnand %p854_p3, %p850_p13 }
  0x3b   : > { %374 = vmatpush.msra.mxu0 %v296_v52 }
  0x3d   : > { %375 = vmatpush.msra.mxu0 %v295_v53 }
  0x3f   : > { %260 = vadd.xlane.f32.xlu1 %v259_v24  ;;  %376 = vmatpush.msra.mxu0 %v294_v54  ;;  %v317_v24 = vadd.s32 4294967288, %v315_v8 }
  0x40   : > { %236 = vadd.xlane.f32.xlu0 %v235_v25 }
  0x41   : > { %239 = vadd.xlane.f32.xlu2 %v238_v26  ;;  %377 = vmatpush.msra.mxu0 %v293_v55 }
  0x43   : > { %378 = vmatpush.msra.mxu0 %v292_v59 }
  0x45   : > { %379 = vmatpush.msra.mxu0 %v291_v60  ;;  %v329_v60 = vadd.s32 4294967264, %v315_v8 }
  0x47   : > { %242 = vadd.xlane.f32.xlu1 %v241_v33  ;;  %380 = vmatpush.msra.mxu0 %v290_v61 }
  0x48   : > { %263 = vadd.xlane.f32.xlu0 %v262_v34 }
  0x49   : > { %266 = vadd.xlane.f32.xlu2 %v265_v35  ;;  %v321_v35 = vadd.s32 4294967280, %v315_v8 }
  0x4f   : > { %269 = vadd.xlane.f32.xlu1 %v268_v42 }
  0x50   : > { %245 = vadd.xlane.f32.xlu0 %v244_v43 }
  0x51   : > { %248 = vadd.xlane.f32.xlu2 %v247_v44  ;;  %v325_v44 = vadd.s32 4294967272, %v315_v8 }
  0x58   : > { %272 = vadd.xlane.f32.xlu0 %v271_v47 }
  0xa2   : > { %v252_v49 = vpop.xlane.xlu1 %251 }
  0xa3   : > { %v228_v50 = vpop.xlane.xlu0 %227  ;;  %v282_v26 = vmul.f32 0.00390625, %v252_v49 }
  0xa4   : > { %v234_v51 = vpop.xlane.xlu2 %233  ;;  %v274_v33 = vmul.f32 0.00390625, %v228_v50 }
  0xa5   : > { %v276_v42 = vmul.f32 0.00390625, %v234_v51  ;;  %v345_v52 = vperm.slane %v282_v26, %v315_v8 }
  0xa6   : > { %v316_v53 = vperm.slane %v274_v33, %v315_v8 }
  0xa7   : > { %v322_v59 = vperm.slane %v276_v42, %v321_v35 }
  0xaa   : > { %v255_v56 = vpop.xlane.xlu1 %254 }
  0xab   : > { %v231_v57 = vpop.xlane.xlu0 %230  ;;  %v283_v34 = vmul.f32 0.00390625, %v255_v56  ;;  %v333_v56 = vadd.s32 4294967256, %v315_v8 }
  0xac   : > { %v258_v58 = vpop.xlane.xlu2 %257  ;;  %v275_v25 = vmul.f32 0.00390625, %v231_v57 }
  0xad   : > { %v284_v48 = vmul.f32 0.00390625, %v258_v58  ;;  %v346_v54 = vperm.slane %v283_v34, %v317_v24 }
  0xae   : > { %v318_v43 = vperm.slane %v275_v25, %v317_v24 }
  0xaf   : > { %v348_v32 = vperm.slane %v284_v48, %v321_v35  ;;  %v347_v26 = vsel %vm319_vm0, %v346_v54, %v345_v52 }
  0xb0   : > { %v320_v49 = vsel %vm319_vm0, %v318_v43, %v316_v53 }
  0xb1   : > { %v349_v35 = vsel %vm323_vm1, %v348_v32, %v347_v26 }
  0xb2   : > { %v261_v62 = vpop.xlane.xlu1 %260 }
  0xb3   : > { %v237_v63 = vpop.xlane.xlu0 %236  ;;  %v285_v55 = vmul.f32 0.00390625, %v261_v62 }
  0xb4   : > { %v240_v3 = vpop.xlane.xlu2 %239  ;;  %v277_v47 = vmul.f32 0.00390625, %v237_v63  ;;  %v337_v63 = vadd.s32 4294967248, %v315_v8 }
  0xb5   : > { %v278_v61 = vmul.f32 0.00390625, %v240_v3  ;;  %v350_v24 = vperm.slane %v285_v55, %v325_v44  ;;  %v324_v3 = vsel %vm323_vm1, %v322_v59, %v320_v49 }
  0xb6   : > { %v326_v50 = vperm.slane %v277_v47, %v325_v44 }
  0xb7   : > { %v351_v53 = vsel %vm327_vm2, %v350_v24, %v349_v35 }
  0xb8   : > { %v328_v42 = vsel %vm327_vm2, %v326_v50, %v324_v3 }
  0xba   : > { %v243_v15 = vpop.xlane.xlu1 %242 }
  0xbb   : > { %v264_v16 = vpop.xlane.xlu0 %263  ;;  %v279_v51 = vmul.f32 0.00390625, %v243_v15  ;;  %v341_v15 = vadd.s32 4294967240, %v315_v8 }
  0xbc   : > { %v267_v17 = vpop.xlane.xlu2 %266  ;;  %v286_v7 = vmul.f32 0.00390625, %v264_v16  ;;  %v330_v16 = vperm.slane %v278_v61, %v329_v60 }
  0xbd   : > { %v287_v62 = vmul.f32 0.00390625, %v267_v17  ;;  %v334_v43 = vperm.slane %v279_v51, %v333_v56  ;;  %v405_v51 = vld [vmem:[%s1291_s2] sm:$0xff] }
  0xbe   : > { %v352_v33 = vperm.slane %v286_v7, %v329_v60  ;;  %v332_v17 = vsel %vm331_vm3, %v330_v16, %v328_v42 }
  0xbf   : > { %v354_v52 = vperm.slane %v287_v62, %v333_v56  ;;  %v336_v55 = vsel %vm335_vm4, %v334_v43, %v332_v17  ;;  %v406_v56 = vld [vmem:[%s1291_s2 + $0x8] sm:$0xff] }
  0xc0   : > { %v353_v44 = vsel %vm331_vm3, %v352_v33, %v351_v53  ;;  %425 = vmatpush.msra.mxu1 %v406_v56 }
  0xc1   : > { %v355_v8 = vsel %vm335_vm4, %v354_v52, %v353_v44 }
  0xc2   : > { %v270_v25 = vpop.xlane.xlu1 %269  ;;  %426 = vmatpush.msra.mxu1 %v405_v51 }
  0xc3   : > { %v246_v57 = vpop.xlane.xlu0 %245  ;;  %v288_v34 = vmul.f32 0.00390625, %v270_v25 }
  0xc4   : > { %v280_v31 = vmul.f32 0.00390625, %v246_v57  ;;  %v249_v58 = vpop.xlane.xlu2 %248 }
  0xc5   : > { %v281_v47 = vmul.f32 0.00390625, %v249_v58  ;;  %v356_v54 = vperm.slane %v288_v34, %v337_v63 }
  0xc6   : > { %v338_v48 = vperm.slane %v280_v31, %v337_v63 }
  0xc7   : > { %v342_v59 = vperm.slane %v281_v47, %v341_v15  ;;  %v357_v32 = vsel %vm339_vm5, %v356_v54, %v355_v8 }
  0xc8   : > { %v340_v61 = vsel %vm339_vm5, %v338_v48, %v336_v55  ;;  %v1303_v48 = vlaneseq }
  0xc9   : > { %v344_v31 = vsel %vm343_vm6, %v342_v59, %v340_v61 }
  0xca   : > { %v452_v53 = vshrl.u32 %v1303_v48, 7 }
  0xcb   : > { %v273_v7 = vpop.xlane.xlu0 %272 }
  0xcc   : > { %v289_v60 = vmul.f32 0.00390625, %v273_v7  ;;  %776 = vset.pattern.permute.xlu1 %v452_v53  ;;  %v465_v52 = vadd.s32 16, %v452_v53  ;;  %v459_v17 = vadd.s32 8, %v452_v53 }
  0xce   : > { %v358_v57 = vperm.slane %v289_v60, %v341_v15  ;;  %778 = vset.pattern.permute.xlu0 %v465_v52  ;;  %777 = vset.pattern.permute.xlu2 %v459_v17 }
  0xd0   : > { %v359_v49 = vsel %vm343_vm6, %v358_v57, %v357_v32 }
  0xd1   : > { %v361_v50 = vsel %vm360_vm7, %v359_v49, %v344_v31 }
  0xd2   : > { %712 = vmatmul.msk.f32.vlgmr.msra.gmra.mxu0 %vm362_vm8, %v361_v50 }
 0x14f   : > { %v382_v25 = vpop.f32.mrf.mxu0 }
 0x150   : > { %v713_v63 = vmul.f32 -1.442695, %v382_v25 }
 0x152   : > { %793 = vpow2.f32 %v713_v63  ;;  %v477_v63 = vadd.s32 32, %v452_v53 }
 0x158   : > { %v794_v58 = vpop.eup %793 }
 0x159   : > { %v388_v26 = vadd.f32 1.0, %v794_v58 }
 0x15b   : > { %795 = vrcp.f32 %v388_v26  ;;  %v400_v16 = vand.u32 2147483648, %v388_v26  ;;  %v398_v34 = vand.u32 2147483647, %v388_v26  ;;  %vm394_vm10 = vweird.f32 %v388_v26 }
 0x15d   : > { %v401_v43 = vor.u32 1.1754944e-38, %v400_v16  ;;  %vm399_vm12 = vcmp.eq.f32.partialorder %v398_v34, 8.507059e+37 }
 0x161   : > { %v796_v24 = vpop.eup %795 }
 0x162   : > { %v390_v62 = vmul.f32 %v796_v24, %v388_v26  ;;  %vm395_vm9 = vweird.f32 %v796_v24  ;;  %v489_v26 = vadd.s32 48, %v452_v53 }
 0x163   : > { %vm396_vm11 = vmor %vm394_vm10, %vm395_vm9 }
 0x164   : > { %v391_v3 = vsub.f32 1.0, %v390_v62  ;;  %v495_v62 = vadd.s32 56, %v452_v53 }
 0x166   : > { %v392_v33 = vmul.f32 %v796_v24, %v391_v3 }
 0x168   : > { %v393_v42 = vadd.f32 %v796_v24, %v392_v33 }
 0x16a   : > { %v397_v15 = vsel %vm396_vm11, %v796_v24, %v393_v42  ;;  %v483_v24 = vadd.s32 40, %v452_v53 }
 0x16b   : > { %v402_v47 = vsel %vm399_vm12, %v401_v43, %v397_v15 }
 0x16c   : > { %v404_v35 = vmul.f32 %v402_v47, %v382_v25  ;;  %v471_v25 = vadd.s32 24, %v452_v53 }
 0x16e   : > { %714 = vmatmul.msk.f32.vlgmr.msra.gmra.mxu1 %vm407_vm13, %v404_v35 }
 0x1eb   : > { %v428_v44 = vpop.f32.mrf.mxu1 }
 0x1ec   : > { %v715_v54 = vmul.f32 -1.442695, %v428_v44 }
 0x1ee   : > { %797 = vpow2.f32 %v715_v54 }
 0x1f4   : > { %v798_v7 = vpop.eup %797 }
 0x1f5   : > { %v434_v55 = vadd.f32 1.0, %v798_v7 }
 0x1f7   : > { %799 = vrcp.f32 %v434_v55  ;;  %v446_v8 = vand.u32 2147483648, %v434_v55  ;;  %v444_v32 = vand.u32 2147483647, %v434_v55  ;;  %vm440_vm15 = vweird.f32 %v434_v55 }
 0x1f9   : > { %v447_v49 = vor.u32 1.1754944e-38, %v446_v8  ;;  %vm445_vm1 = vcmp.eq.f32.partialorder %v444_v32, 8.507059e+37  ;;  %v1305_v8 = vld [vmem:[#allocation9_spill] sm:$0xff] }
 0x1fd   : > { %v800_v59 = vpop.eup %799 }
 0x1fe   : > { %v436_v60 = vmul.f32 %v800_v59, %v434_v55  ;;  %vm441_vm14 = vweird.f32 %v800_v59 }
 0x1ff   : > { %vm442_vm0 = vmor %vm440_vm15, %vm441_vm14 }
 0x200   : > { %v437_v61 = vsub.f32 1.0, %v436_v60 }
 0x202   : > { %v438_v57 = vmul.f32 %v800_v59, %v437_v61 }
 0x204   : > { %v439_v31 = vadd.f32 %v800_v59, %v438_v57 }
 0x206   : > { %v443_v50 = vsel %vm442_vm0, %v800_v59, %v439_v31 }
 0x207   : > { %v448_v56 = vsel %vm445_vm1, %v447_v49, %v443_v50 }
 0x208   : > { %v450_v51 = vperm.slane %v448_v56, 0  ;;  %v499_v58 = vperm.slane %v448_v56, 1 }
 0x20a   : > { %467 = vperm.xlu0 %778, %v450_v51   ;;  %461 = vperm.xlu2 %777, %v450_v51  }
 0x20b   : > { %455 = vperm.xlu1 %776, %v450_v51  }
 0x212   : > { %785 = vset.pattern.permute.xlu0 %v459_v17  ;;  %779 = vset.pattern.permute.xlu2 %v471_v25 }
 0x213   : > { %780 = vset.pattern.permute.xlu1 %v477_v63 }
 0x21a   : > { %510 = vperm.xlu0 %785, %v499_v58   ;;  %473 = vperm.xlu2 %779, %v450_v51  }
 0x21b   : > { %479 = vperm.xlu1 %780, %v450_v51  }
 0x222   : > { %790 = vset.pattern.permute.xlu0 %v489_v26  ;;  %781 = vset.pattern.permute.xlu2 %v483_v24 }
 0x223   : > { %782 = vset.pattern.permute.xlu1 %v489_v26 }
 0x22a   : > { %540 = vperm.xlu0 %790, %v499_v58   ;;  %485 = vperm.xlu2 %781, %v450_v51  }
 0x22b   : > { %491 = vperm.xlu1 %782, %v450_v51  }
 0x232   : > { %783 = vset.pattern.permute.xlu2 %v495_v62  ;;  %792 = vset.pattern.permute.xlu0 %v495_v62 }
 0x233   : > { %784 = vset.pattern.permute.xlu1 %v452_v53 }
 0x23a   : > { %497 = vperm.xlu2 %783, %v450_v51  }
 0x23b   : > { %504 = vperm.xlu1 %784, %v499_v58  }
 0x242   : > { %786 = vset.pattern.permute.xlu2 %v465_v52 }
 0x243   : > { %787 = vset.pattern.permute.xlu1 %v471_v25 }
 0x24a   : > { %516 = vperm.xlu2 %786, %v499_v58  }
 0x24b   : > { %522 = vperm.xlu1 %787, %v499_v58  }
 0x252   : > { %788 = vset.pattern.permute.xlu2 %v477_v63 }
 0x253   : > { %789 = vset.pattern.permute.xlu1 %v483_v24 }
 0x25a   : > { %528 = vperm.xlu2 %788, %v499_v58  }
 0x25b   : > { %534 = vperm.xlu1 %789, %v499_v58  }
 0x262   : > { %791 = vset.pattern.permute.xlu2 %v495_v62 }
 0x264   : > { %v462_v3 = vpop.permute.xlu2 %461 }
 0x265   : > { %v550_v16 = vmul.f32 %v462_v3, %v1051_v11  ;;  %v551_v33 = vmul.f32 %v462_v3, %v1054_v12 }
 0x267   : > { %582 = vst [vmem:[%s1192_s9 + $0x10] sm:$0xff] %v550_v16 }
 0x268   : > { %583 = vst [vmem:[%s1192_s9 + $0x18] sm:$0xff] %v551_v33 }
 0x26a   : > { %546 = vperm.xlu2 %791, %v499_v58  }
 0x274   : > { %v474_v34 = vpop.permute.xlu2 %473 }
 0x275   : > { %v554_v42 = vmul.f32 %v474_v34, %v1075_v20  ;;  %v555_v11 = vmul.f32 %v474_v34, %v1078_v21 }
 0x277   : > { %586 = vst [vmem:[%s1192_s9 + $0x30] sm:$0xff] %v554_v42 }
 0x278   : > { %587 = vst [vmem:[%s1192_s9 + $0x38] sm:$0xff] %v555_v11 }
 0x27c   : > { %v468_v12 = vpop.permute.xlu0 %467 }
 0x27d   : > { %v552_v43 = vmul.f32 %v468_v12, %v1035_v5  ;;  %v553_v15 = vmul.f32 %v468_v12, %v1038_v6  ;;  %v456_v47 = vpop.permute.xlu1 %455 }
 0x27e   : > { %v548_v35 = vmul.f32 %v456_v47, %v1027_v2  ;;  %v549_v48 = vmul.f32 %v456_v47, %v1032_v4 }
 0x27f   : > { %584 = vst [vmem:[%s1192_s9 + $0x20] sm:$0xff] %v552_v43 }
 0x280   : > { %585 = vst [vmem:[%s1192_s9 + $0x28] sm:$0xff] %v553_v15 }
 0x281   : > { %580 = vst [vmem:[%s1192_s9] sm:$0xff] %v548_v35 }
 0x282   : > { %581 = vst [vmem:[%s1192_s9 + $0x8] sm:$0xff] %v549_v48 }
 0x284   : > { %v486_v20 = vpop.permute.xlu2 %485 }
 0x285   : > { %v558_v21 = vmul.f32 %v486_v20, %v1093_v27  ;;  %v559_v5 = vmul.f32 %v486_v20, %v1096_v28 }
 0x287   : > { %590 = vst [vmem:[%s1192_s9 + $0x50] sm:$0xff] %v558_v21 }
 0x288   : > { %591 = vst [vmem:[%s1192_s9 + $0x58] sm:$0xff] %v559_v5 }
 0x28c   : > { %v511_v2 = vpop.permute.xlu0 %510 }
 0x28d   : > { %v566_v4 = vmul.f32 %v511_v2, %v1045_v9  ;;  %v567_v6 = vmul.f32 %v511_v2, %v1048_v10  ;;  %v480_v53 = vpop.permute.xlu1 %479 }
 0x28e   : > { %v556_v52 = vmul.f32 %v480_v53, %v1081_v22  ;;  %v557_v17 = vmul.f32 %v480_v53, %v1084_v23 }
 0x28f   : > { %598 = vst [vmem:[%s1192_s9 + $0x90] sm:$0xff] %v566_v4 }
 0x290   : > { %599 = vst [vmem:[%s1192_s9 + $0x98] sm:$0xff] %v567_v6 }
 0x291   : > { %588 = vst [vmem:[%s1192_s9 + $0x40] sm:$0xff] %v556_v52 }
 0x292   : > { %589 = vst [vmem:[%s1192_s9 + $0x48] sm:$0xff] %v557_v17 }
 0x294   : > { %v498_v27 = vpop.permute.xlu2 %497 }
 0x295   : > { %v562_v28 = vmul.f32 %v498_v27, %v1129_v40  ;;  %v563_v9 = vmul.f32 %v498_v27, %v1132_v41 }
 0x297   : > { %594 = vst [vmem:[%s1192_s9 + $0x70] sm:$0xff] %v562_v28 }
 0x298   : > { %595 = vst [vmem:[%s1192_s9 + $0x78] sm:$0xff] %v563_v9 }
 0x29c   : > { %v541_v10 = vpop.permute.xlu0 %540 }
 0x29d   : > { %v576_v22 = vmul.f32 %v541_v10, %v1117_v36  ;;  %v577_v23 = vmul.f32 %v541_v10, %v1120_v37  ;;  %v492_v44 = vpop.permute.xlu1 %491 }
 0x29e   : > { %v560_v54 = vmul.f32 %v492_v44, %v1123_v38  ;;  %v561_v7 = vmul.f32 %v492_v44, %v1126_v39 }
 0x29f   : > { %608 = vst [vmem:[%s1192_s9 + $0xe0] sm:$0xff] %v576_v22 }
 0x2a0   : > { %609 = vst [vmem:[%s1192_s9 + $0xe8] sm:$0xff] %v577_v23 }
 0x2a1   : > { %592 = vst [vmem:[%s1192_s9 + $0x60] sm:$0xff] %v560_v54 }
 0x2a2   : > { %593 = vst [vmem:[%s1192_s9 + $0x68] sm:$0xff] %v561_v7 }
 0x2a4   : > { %v517_v40 = vpop.permute.xlu2 %516 }
 0x2a5   : > { %v568_v41 = vmul.f32 %v517_v40, %v1057_v13  ;;  %v569_v36 = vmul.f32 %v517_v40, %v1060_v14 }
 0x2a7   : > { %600 = vst [vmem:[%s1192_s9 + $0xa0] sm:$0xff] %v568_v41 }
 0x2a8   : > { %601 = vst [vmem:[%s1192_s9 + $0xa8] sm:$0xff] %v569_v36 }
 0x2ad   : > { %v505_v37 = vpop.permute.xlu1 %504 }
 0x2ae   : > { %v564_v38 = vmul.f32 %v505_v37, %v1021_v0  ;;  %v565_v39 = vmul.f32 %v505_v37, %v1024_v1 }
 0x2b0   : > { %596 = vst [vmem:[%s1192_s9 + $0x80] sm:$0xff] %v564_v38 }
 0x2b1   : > { %597 = vst [vmem:[%s1192_s9 + $0x88] sm:$0xff] %v565_v39 }
 0x2b4   : > { %v529_v55 = vpop.permute.xlu2 %528 }
 0x2b5   : > { %v572_v59 = vmul.f32 %v529_v55, %v1099_v29  ;;  %v573_v13 = vmul.f32 %v529_v55, %v1102_v30 }
 0x2b7   : > { %604 = vst [vmem:[%s1192_s9 + $0xc0] sm:$0xff] %v572_v59 }
 0x2b8   : > { %605 = vst [vmem:[%s1192_s9 + $0xc8] sm:$0xff] %v573_v13 }
 0x2bd   : > { %v523_v14 = vpop.permute.xlu1 %522 }
 0x2be   : > { %v570_v60 = vmul.f32 %v523_v14, %v1069_v18  ;;  %v571_v0 = vmul.f32 %v523_v14, %v1072_v19  ;;  %v1304_v19 = vld [vmem:[#allocation8_spill] sm:$0xff] }
 0x2c0   : > { %602 = vst [vmem:[%s1192_s9 + $0xb0] sm:$0xff] %v570_v60 }
 0x2c1   : > { %603 = vst [vmem:[%s1192_s9 + $0xb8] sm:$0xff] %v571_v0 }
 0x2c4   : > { %v547_v1 = vpop.permute.xlu2 %546 }
 0x2c5   : > { %v578_v61 = vmul.f32 %v547_v1, %v1141_v45  ;;  %v579_v29 = vmul.f32 %v547_v1, %v1144_v46 }
 0x2c7   : > { %610 = vst [vmem:[%s1192_s9 + $0xf0] sm:$0xff] %v578_v61 }
 0x2c8   : > { %611 = vst [vmem:[%s1192_s9 + $0xf8] sm:$0xff] %v579_v29 }
 0x2cd   : > { %v535_v18 = vpop.permute.xlu1 %534 }
 0x2ce   : > { %v574_v30 = vmul.f32 %v535_v18, %v1304_v19  ;;  %v575_v57 = vmul.f32 %v535_v18, %v1305_v8 }
 0x2d0   : > { %606 = vst [vmem:[%s1192_s9 + $0xd0] sm:$0xff] %v574_v30 }
 0x2d1   : > { %607 = vst [vmem:[%s1192_s9 + $0xd8] sm:$0xff] %v575_v57 }
 0x2d2   : > { %858 = shalt.err (!%p855_p4)
}
 0x2d3   : > { %s901_s29 = smov 256   ;;  %s902_s5 = smov 16  }
 0x2d4   : > { %728 = dma.vmem_to_hbm [thread:$0]  (%p972_p10), %s627_s19, 4096, %s629_s20, %s613_s22, %s901_s29, %s901_s29, %s902_s5  }
 0x2d5 PF: > { %p739_p5 = scmp.ge.s32.totalorder %s897_s15, 2  ;;  %s643_s7 = sand.u32 1, %s885_s12  }
 0x2d6   : > { %s644_s8 = scalar_lea.sflag [#allocation4], %s643_s7 }
 0x2d7   : > { %p735_p7 = pnand %p739_p5, %p976_p11 }
 0x2d9   : > { %p736_p8 = pneg %p735_p7 }
 0x2db   : > { %880 = dma.done.wait (%p736_p8), %s644_s8, 4096  }
 0x2dc   : > { %882 = vsyncadd (%p736_p8), %s644_s8, 4294963200  ;;  %p16_p9 = scmp.ge.s32.totalorder %s948_s18, 6   ;;  %s1306_s12 = smov %s889_s13 }
 0x2dd   : > { %s1307_s13 = smov %s893_s14  ;;  %s1308_s14 = smov %s960_s21 }
 0x2de   : > { %s1309_s15 = smov %s948_s18  ;;  %18 = sbr.rel (!%p16_p9) target bundleno = 5 (0x5), region = 77 }
 0x2e3   :  { %650 = vsyncpa [#allocation3], 1 }
 0x2e4   :  { %652 = vsyncpa [#allocation3 + $0x1], 1 }
 0x2e5   :  { %653 = vsyncpa [#allocation4], 1 }
 0x2e6   :  { %655 = vsyncpa [#allocation4 + $0x1], 1 }

</bundles_post_ra>
